<compile_context>
chip_gen: v6e
topology: v6e:2x2x1
jax: 0.10.0
libtpu: 0.0.40
codegen_flags: <defaults>
</compile_context>

<pallas_src>
import jax
import jax.numpy as jnp
from jax.experimental import pallas as pl
from jax.experimental.pallas import tpu as pltpu


def _newsp_kernel(x_ref, wp_ref, w1_ref, w2_ref, sh_ref, e_ref, w3_ref, b3_ref,
                  o_ref):
    """Fully batch-tiled body — every dot covers the whole (bt) tile.

    x_ref : (bt*C, H, W)      input tile (batch*channel stacked on rows)
    wp_ref: (2,)   SMEM       conv_pool mixing scalars (avg, max)
    w1_ref: (bt*MID, 3*bt*C)  conv1 taps, block-diag over the tile, BN1 scale folded
    w2_ref: (bt*MID, 3*bt*C)  conv2 taps, block-diag over the tile, BN2 scale folded
    sh_ref: (bt*MID, 1)       BN1 shift + BN2 shift, tiled over the batch tile
    e_ref : (H+W, H*W)        expansion operator (0/1): row h -> lanes h*W..h*W+W-1,
                              row H+w -> lanes {w, w+W, ...}
    w3_ref: (bt*OUT, bt*MID)  1x1 conv weight, block-diag over the tile
    b3_ref: (bt*OUT, 1)       1x1 conv bias, tiled
    o_ref : (bt*OUT, H*W)     sublane- and lane-dense output tile
    """
    f32 = jnp.float32
    H, W = x_ref.shape[1], x_ref.shape[2]
    wdt = w1_ref.dtype
    wp0 = wp_ref[0]
    wp1 = wp_ref[1]

    # ---- strip pools, batched over the whole tile (rows = bt*C) -------------
    x = x_ref[...].astype(f32)                                   # (bt*C, H, W)
    p1 = wp0 * jnp.mean(x, axis=2) + wp1 * jnp.max(x, axis=2)    # (bt*C, H)  pool over W
    p2 = wp0 * jnp.mean(x, axis=1) + wp1 * jnp.max(x, axis=1)    # (bt*C, W)  pool over H

    # ---- 3-tap strip convs: ONE dot per branch for the whole tile -----------
    rows = p1.shape[0]
    z = jnp.zeros((rows, 1), f32)
    taps1 = jnp.concatenate(
        [jnp.concatenate([z, p1[:, :-1]], axis=1),               # h-1 (zero pad)
         p1,                                                     # h
         jnp.concatenate([p1[:, 1:], z], axis=1)],               # h+1
        axis=0)                                                  # (3*bt*C, H)
    taps2 = jnp.concatenate(
        [jnp.concatenate([z, p2[:, :-1]], axis=1),
         p2,
         jnp.concatenate([p2[:, 1:], z], axis=1)],
        axis=0)                                                  # (3*bt*C, W)
    a1 = jnp.dot(w1_ref[...], taps1.astype(wdt),
                 preferred_element_type=f32)                     # (bt*MID, H)
    a2 = jnp.dot(w2_ref[...], taps2.astype(wdt),
                 preferred_element_type=f32)                     # (bt*MID, W)

    # ---- broadcast-add over the full map via one lane-dense expansion dot ---
    a12 = jnp.concatenate([a1, a2], axis=1)                      # (bt*MID, H+W)
    t = jnp.dot(a12.astype(wdt), e_ref[...],
                preferred_element_type=f32) + sh_ref[...]
    t = jnp.maximum(t, 0.0)                                      # (bt*MID, H*W)

    # ---- 1x1 conv + bias + sigmoid: one dot for the whole tile --------------
    y = jnp.dot(w3_ref[...], t.astype(wdt),
                preferred_element_type=f32) + b3_ref[...]
    o_ref[...] = jax.nn.sigmoid(y).astype(o_ref.dtype)           # (bt*OUT, H*W)


def _vmem_budget_bytes():
    """Scoped-VMEM budget: half of physical VMEM, capped at 64 MiB."""
    cap = 128 * 2**20
    try:
        info = pltpu.get_tpu_info()
        cap = int(getattr(info, "vmem_capacity_bytes", cap) or cap)
    except Exception:
        pass
    return max(16 * 2**20, min(cap // 2, 64 * 2**20))


def _num_tensorcores():
    """Best-effort TensorCore count (1 on v5e/v6e, 2 on v7x); 1 if unknown."""
    try:
        info = pltpu.get_tpu_info()
        for name in ("num_cores", "tensorcore_count", "num_tensorcores",
                     "cores_per_chip"):
            v = getattr(info, name, None)
            if v:
                return int(v)
    except Exception:
        pass
    return 1


def _pick_batch_tile(B, C, MID, OUT, H, W, in_itemsize, w_itemsize, budget):
    """Largest batch tile whose working set fits the VMEM budget.

    Accounts for double-buffered input/output blocks, the packed weights
    (the block-diagonal ones grow as bt^2, so bt is automatically capped for
    large C/MID and on small-VMEM parts) and the big intermediates.
    The grid>=cores preference only applies on multi-TensorCore chips.
    """
    HW = H * W

    def need(bt):
        xb = bt * C * HW * in_itemsize                 # one input block
        ob = bt * OUT * HW * in_itemsize               # one output block
        wts = (2 * (bt * MID) * (3 * bt * C)           # w1_blk, w2_blk
               + (bt * OUT) * (bt * MID)               # w3_blk
               + (H + W) * HW) * w_itemsize            # e12
        inter = (bt * MID * HW + bt * OUT * HW         # t, y
                 + 8 * bt * C * (H + W)) * 4           # pools / taps (rough)
        return 2 * (xb + ob) + 2 * wts + inter         # in/out + weights dbl-buffered

    feas = [d for d in range(1, B + 1)
            if B % d == 0 and need(d) <= budget
            and (d == B or (d * OUT) % 8 == 0)]        # sublane-dense output blocks
    if not feas:
        return 1
    cores = _num_tensorcores()
    if cores > 1:                                      # >=1 grid step per TensorCore
        multi = [d for d in feas if (B // d) >= cores]
        if multi:
            return max(multi)
    return max(feas)


def newsp_block_pallas(x_nchw, params):
    """NEWSPBlock forward.  x_nchw: (B, C, H, W) -> (B, OUT, H, W)."""
    (wp, w1, w2, bn1_scale, bn1_shift, bn2_scale, bn2_shift, w3, b3) = params
    B, C, H, W = x_nchw.shape
    MID = w1.shape[0]
    OUT = w3.shape[0]
    HW = H * W
    f32 = jnp.float32
    # bf16 operands only when the input is bf16 (keeps the f32 path accurate
    # vs. the HIGHEST-precision reference; e12 is 0/1 so exact either way).
    wdt = jnp.bfloat16 if x_nchw.dtype == jnp.bfloat16 else f32

    budget = _vmem_budget_bytes()
    in_isz = jnp.dtype(x_nchw.dtype).itemsize
    w_isz = jnp.dtype(wdt).itemsize
    bt = _pick_batch_tile(B, C, MID, OUT, H, W, in_isz, w_isz, budget)

    # ---- one-time operand packing (tiny; fused / cached under jax.jit) ------
    # TODO(synk): for very large C/MID the block-diagonal tap weights grow as
    #             bt^2 (extra MACs); the VMEM budget caps bt automatically, but
    #             a shared-weight (MID,3C)@(3C,bt*H) formulation would avoid it.
    eye_bt = jnp.eye(bt, dtype=f32)
    w1s = (bn1_scale[:, None, None] * w1).astype(f32)            # (MID, C, 3)
    w2s = (bn2_scale[:, None, None] * w2).astype(f32)
    w1_blk = jnp.concatenate([jnp.kron(eye_bt, w1s[:, :, k]) for k in range(3)],
                             axis=1).astype(wdt)                 # (bt*MID, 3*bt*C)
    w2_blk = jnp.concatenate([jnp.kron(eye_bt, w2s[:, :, k]) for k in range(3)],
                             axis=1).astype(wdt)
    w3_blk = jnp.kron(eye_bt, w3.astype(f32)).astype(wdt)        # (bt*OUT, bt*MID)
    sh_blk = jnp.tile((bn1_shift + bn2_shift).reshape(MID, 1), (bt, 1)).astype(f32)
    b3_blk = jnp.tile(b3.reshape(OUT, 1), (bt, 1)).astype(f32)

    # Expansion operator: e[h, h*W+w] = 1 and e[H+w, h*W+w] = 1, so
    # (a12 @ e)[r, h*W+w] = a1[r, h] + a2[r, w]  (lane-dense over h*W+w).
    hw = jnp.arange(HW, dtype=jnp.int32)
    e1 = hw[None, :] // W == jnp.arange(H, dtype=jnp.int32)[:, None]
    e2 = hw[None, :] % W == jnp.arange(W, dtype=jnp.int32)[:, None]
    e12 = jnp.concatenate([e1, e2], axis=0).astype(wdt)          # (H+W, HW)

    x_in = x_nchw.reshape(B * C, H, W)       # free contiguous view, rows = (b, c)

    flops = 2 * B * (MID * 3 * C * (H + W)   # strip convs
                     + MID * (H + W) * HW    # expansion
                     + OUT * MID * HW)       # 1x1 conv
    flops += 6 * B * C * HW                  # pooling (mean/max over two axes)
    bytes_accessed = (B * C * HW + B * OUT * HW) * in_isz + (H + W) * HW * w_isz

    out = pl.pallas_call(
        _newsp_kernel,
        out_shape=jax.ShapeDtypeStruct((B * OUT, HW), x_nchw.dtype),
        grid=(B // bt,),
        in_specs=[
            pl.BlockSpec((bt * C, H, W), lambda b: (b, 0, 0)),
            pl.BlockSpec((2,), lambda b: (0,),
                         memory_space=pltpu.MemorySpace.SMEM),
            # Grid-invariant operands (constant index maps).
            # NOTE: left on default pipelining for robustness; at very large
            # H*W mark these pl.Buffered(1) (or stage via scratch) to halve
            # their VMEM footprint.
            pl.BlockSpec((bt * MID, 3 * bt * C), lambda b: (0, 0)),
            pl.BlockSpec((bt * MID, 3 * bt * C), lambda b: (0, 0)),
            pl.BlockSpec((bt * MID, 1), lambda b: (0, 0)),
            pl.BlockSpec((H + W, HW), lambda b: (0, 0)),
            pl.BlockSpec((bt * OUT, bt * MID), lambda b: (0, 0)),
            pl.BlockSpec((bt * OUT, 1), lambda b: (0, 0)),
        ],
        out_specs=pl.BlockSpec((bt * OUT, HW), lambda b: (b, 0)),
        compiler_params=pltpu.CompilerParams(
            dimension_semantics=("parallel",),
            vmem_limit_bytes=int(budget)),
        cost_estimate=pl.CostEstimate(flops=int(flops),
                                      transcendentals=int(B * OUT * HW),
                                      bytes_accessed=int(bytes_accessed)),
    )(x_in, wp.astype(f32), w1_blk, w2_blk, sh_blk, e12, w3_blk, b3_blk)

    # (B*OUT, H*W) -> (B, OUT, H, W): contiguous reshape, free view.
    return out.reshape(B, OUT, H, W)


def newsp_block_ref(x, params):
    """Pure-JAX reference mirroring the PyTorch forward (NCHW)."""
    (wp, w1, w2, bn1_scale, bn1_shift, bn2_scale, bn2_shift, w3, b3) = params
    B, C, H, W = x.shape
    hp = jax.lax.Precision.HIGHEST

    avg_w = x.mean(axis=3); max_w = x.max(axis=3)              # (B,C,H)
    p1 = wp[0] * avg_w + wp[1] * max_w
    p1p = jnp.pad(p1, ((0, 0), (0, 0), (1, 1)))
    a1 = sum(jnp.einsum('mc,bch->bmh', w1[:, :, t], p1p[:, :, t:t + H],
                        precision=hp) for t in range(3))
    a1 = a1 * bn1_scale[None, :, None] + bn1_shift[None, :, None]

    avg_h = x.mean(axis=2); max_h = x.max(axis=2)              # (B,C,W)
    p2 = wp[0] * avg_h + wp[1] * max_h
    p2p = jnp.pad(p2, ((0, 0), (0, 0), (1, 1)))
    a2 = sum(jnp.einsum('mc,bcw->bmw', w2[:, :, t], p2p[:, :, t:t + W],
                        precision=hp) for t in range(3))
    a2 = a2 * bn2_scale[None, :, None] + bn2_shift[None, :, None]

    t = jnp.maximum(a1[:, :, :, None] + a2[:, :, None, :], 0.0)   # (B,MID,H,W)
    y = jnp.einsum('om,bmhw->bohw', w3, t, precision=hp) + b3[None, :, None, None]
    return jax.nn.sigmoid(y)


if __name__ == "__main__":
    B, IN, OUT, H, W = 2, 4, 4, 16, 16
    MID = OUT  # midplanes = outplanes

    key = jax.random.PRNGKey(0)
    keys = jax.random.split(key, 14)
    x = jax.random.normal(keys[0], (B, IN, H, W), jnp.float32)

    # conv_pool: Conv2d(2, 1, (1,1), bias=False) -> weight (2,)
    wp = 0.7 * jax.random.normal(keys[1], (2,), jnp.float32)
    # conv1: Conv2d(IN, MID, (3,1), bias=False) -> (MID, IN, 3)
    w1 = 0.4 * jax.random.normal(keys[2], (MID, IN, 3), jnp.float32)
    # conv2: Conv2d(IN, MID, (1,3), bias=False) -> (MID, IN, 3)
    w2 = 0.4 * jax.random.normal(keys[3], (MID, IN, 3), jnp.float32)
    # BatchNorm (eval mode) params, folded to scale/shift
    eps = 1e-5
    g1 = 1.0 + 0.1 * jax.random.normal(keys[4], (MID,), jnp.float32)
    b1 = 0.1 * jax.random.normal(keys[5], (MID,), jnp.float32)
    m1 = 0.1 * jax.random.normal(keys[6], (MID,), jnp.float32)
    v1 = 1.0 + 0.1 * jax.random.uniform(keys[7], (MID,), jnp.float32)
    g2 = 1.0 + 0.1 * jax.random.normal(keys[8], (MID,), jnp.float32)
    b2 = 0.1 * jax.random.normal(keys[9], (MID,), jnp.float32)
    m2 = 0.1 * jax.random.normal(keys[10], (MID,), jnp.float32)
    v2 = 1.0 + 0.1 * jax.random.uniform(keys[11], (MID,), jnp.float32)
    bn1_scale = g1 / jnp.sqrt(v1 + eps); bn1_shift = b1 - m1 * bn1_scale
    bn2_scale = g2 / jnp.sqrt(v2 + eps); bn2_shift = b2 - m2 * bn2_scale
    # conv3: Conv2d(MID, OUT, 1, bias=True)
    w3 = 0.4 * jax.random.normal(keys[12], (OUT, MID), jnp.float32)
    b3 = 0.1 * jax.random.normal(keys[13], (OUT,), jnp.float32)

    params = (wp, w1, w2, bn1_scale, bn1_shift, bn2_scale, bn2_shift, w3, b3)

    fwd = jax.jit(newsp_block_pallas)   # packing + kernel fused / cached
    out = jax.block_until_ready(fwd(x, params))
    ref = jax.block_until_ready(newsp_block_ref(x, params))

    assert out.shape == (B, OUT, H, W), out.shape
    max_err = float(jnp.max(jnp.abs(out - ref)))
    assert max_err < 2e-3, f"max abs error too large: {max_err}"
    print("KERNEL_OK")
</pallas_src>

<mosaic_0001>
module attributes {stable_mosaic.version = 11 : i64} {
  func.func @_newsp_kernel(%arg0: i32, %arg1: memref<8x16x16xf32, #tpu.memory_space<vmem>>, %arg2: memref<2xf32, #tpu.memory_space<smem>>, %arg3: memref<8x24xf32, #tpu.memory_space<vmem>>, %arg4: memref<8x24xf32, #tpu.memory_space<vmem>>, %arg5: memref<8x1xf32, #tpu.memory_space<vmem>>, %arg6: memref<32x256xf32, #tpu.memory_space<vmem>>, %arg7: memref<8x8xf32, #tpu.memory_space<vmem>>, %arg8: memref<8x1xf32, #tpu.memory_space<vmem>>, %arg9: memref<8x256xf32, #tpu.memory_space<vmem>>) attributes {dimension_semantics = [#tpu.dimension_semantics<parallel>], iteration_bounds = array<i64: 1>, scalar_prefetch = 0 : i64, scratch_operands = 0 : i64, tpu.core_type = #tpu.core_type<tc>, window_params = [{transform_indices = @transform_0, window_bounds = array<i64: 8, 16, 16>}, {transform_indices = @transform_1, window_bounds = array<i64: 2>}, {pipeline_mode = #tpu.pipeline_mode<synchronous>, transform_indices = @transform_2, window_bounds = array<i64: 8, 24>}, {pipeline_mode = #tpu.pipeline_mode<synchronous>, transform_indices = @transform_3, window_bounds = array<i64: 8, 24>}, {pipeline_mode = #tpu.pipeline_mode<synchronous>, transform_indices = @transform_4, window_bounds = array<i64: 8, 1>}, {pipeline_mode = #tpu.pipeline_mode<synchronous>, transform_indices = @transform_5, window_bounds = array<i64: 32, 256>}, {pipeline_mode = #tpu.pipeline_mode<synchronous>, transform_indices = @transform_6, window_bounds = array<i64: 8, 8>}, {pipeline_mode = #tpu.pipeline_mode<synchronous>, transform_indices = @transform_7, window_bounds = array<i64: 8, 1>}, {transform_indices = @transform_8, window_bounds = array<i64: 8, 256>}]} {
    %c0 = arith.constant 0 : index
    %0 = memref.load %arg2[%c0] : memref<2xf32, #tpu.memory_space<smem>>
    %c1 = arith.constant 1 : index
    %1 = memref.load %arg2[%c1] : memref<2xf32, #tpu.memory_space<smem>>
    %c0_0 = arith.constant 0 : index
    %c0_1 = arith.constant 0 : index
    %c0_2 = arith.constant 0 : index
    %2 = vector.load %arg1[%c0_0, %c0_1, %c0_2] : memref<8x16x16xf32, #tpu.memory_space<vmem>>, vector<8x16x16xf32>
    %cst = arith.constant dense<0.000000e+00> : vector<8x16xf32>
    %3 = vector.multi_reduction <add>, %2, %cst [2] : vector<8x16x16xf32> to vector<8x16xf32>
    %cst_3 = arith.constant 1.600000e+01 : f32
    %4 = vector.broadcast %cst_3 : f32 to vector<8x16xf32>
    %5 = arith.divf %3, %4 : vector<8x16xf32>
    %6 = vector.broadcast %0 : f32 to vector<8x16xf32>
    %7 = arith.mulf %6, %5 : vector<8x16xf32>
    %cst_4 = arith.constant dense<0xFF800000> : vector<8x16xf32>
    %8 = vector.multi_reduction <maximumf>, %2, %cst_4 [2] : vector<8x16x16xf32> to vector<8x16xf32>
    %9 = vector.broadcast %1 : f32 to vector<8x16xf32>
    %10 = arith.mulf %9, %8 : vector<8x16xf32>
    %11 = arith.addf %7, %10 : vector<8x16xf32>
    %cst_5 = arith.constant dense<0.000000e+00> : vector<8x16xf32>
    %12 = vector.multi_reduction <add>, %2, %cst_5 [1] : vector<8x16x16xf32> to vector<8x16xf32>
    %cst_6 = arith.constant 1.600000e+01 : f32
    %13 = vector.broadcast %cst_6 : f32 to vector<8x16xf32>
    %14 = arith.divf %12, %13 : vector<8x16xf32>
    %15 = vector.broadcast %0 : f32 to vector<8x16xf32>
    %16 = arith.mulf %15, %14 : vector<8x16xf32>
    %cst_7 = arith.constant dense<0xFF800000> : vector<8x16xf32>
    %17 = vector.multi_reduction <maximumf>, %2, %cst_7 [1] : vector<8x16x16xf32> to vector<8x16xf32>
    %18 = vector.broadcast %1 : f32 to vector<8x16xf32>
    %19 = arith.mulf %18, %17 : vector<8x16xf32>
    %20 = arith.addf %16, %19 : vector<8x16xf32>
    %cst_8 = arith.constant 0.000000e+00 : f32
    %21 = vector.broadcast %cst_8 : f32 to vector<8x1xf32>
    %22 = vector.extract_strided_slice %11 {offsets = [0, 0], sizes = [8, 15], strides = [1, 1]} : vector<8x16xf32> to vector<8x15xf32>
    %23 = tpu.concatenate %21, %22 in 1 : vector<8x1xf32>, vector<8x15xf32> -> vector<8x16xf32>
    %24 = vector.extract_strided_slice %11 {offsets = [0, 1], sizes = [8, 15], strides = [1, 1]} : vector<8x16xf32> to vector<8x15xf32>
    %25 = tpu.concatenate %24, %21 in 1 : vector<8x15xf32>, vector<8x1xf32> -> vector<8x16xf32>
    %26 = tpu.concatenate %23, %11, %25 in 0 : vector<8x16xf32>, vector<8x16xf32>, vector<8x16xf32> -> vector<24x16xf32>
    %27 = vector.extract_strided_slice %20 {offsets = [0, 0], sizes = [8, 15], strides = [1, 1]} : vector<8x16xf32> to vector<8x15xf32>
    %28 = tpu.concatenate %21, %27 in 1 : vector<8x1xf32>, vector<8x15xf32> -> vector<8x16xf32>
    %29 = vector.extract_strided_slice %20 {offsets = [0, 1], sizes = [8, 15], strides = [1, 1]} : vector<8x16xf32> to vector<8x15xf32>
    %30 = tpu.concatenate %29, %21 in 1 : vector<8x15xf32>, vector<8x1xf32> -> vector<8x16xf32>
    %31 = tpu.concatenate %28, %20, %30 in 0 : vector<8x16xf32>, vector<8x16xf32>, vector<8x16xf32> -> vector<24x16xf32>
    %c0_9 = arith.constant 0 : index
    %c0_10 = arith.constant 0 : index
    %32 = vector.load %arg3[%c0_9, %c0_10] : memref<8x24xf32, #tpu.memory_space<vmem>>, vector<8x24xf32>
    %cst_11 = arith.constant dense<0.000000e+00> : vector<8x16xf32>
    %33 = tpu.matmul %32, %26, %cst_11 {dimension_numbers = #tpu.dot_dimension_numbers<[1], [0], [0], [1], [0, 0, 1, 1], [], []>} : vector<8x24xf32>, vector<24x16xf32>, vector<8x16xf32> -> vector<8x16xf32>
    %c0_12 = arith.constant 0 : index
    %c0_13 = arith.constant 0 : index
    %34 = vector.load %arg4[%c0_12, %c0_13] : memref<8x24xf32, #tpu.memory_space<vmem>>, vector<8x24xf32>
    %cst_14 = arith.constant dense<0.000000e+00> : vector<8x16xf32>
    %35 = tpu.matmul %34, %31, %cst_14 {dimension_numbers = #tpu.dot_dimension_numbers<[1], [0], [0], [1], [0, 0, 1, 1], [], []>} : vector<8x24xf32>, vector<24x16xf32>, vector<8x16xf32> -> vector<8x16xf32>
    %36 = tpu.concatenate %33, %35 in 1 : vector<8x16xf32>, vector<8x16xf32> -> vector<8x32xf32>
    %c0_15 = arith.constant 0 : index
    %c0_16 = arith.constant 0 : index
    %37 = vector.load %arg6[%c0_15, %c0_16] : memref<32x256xf32, #tpu.memory_space<vmem>>, vector<32x256xf32>
    %cst_17 = arith.constant dense<0.000000e+00> : vector<8x256xf32>
    %38 = tpu.matmul %36, %37, %cst_17 {dimension_numbers = #tpu.dot_dimension_numbers<[1], [0], [0], [1], [0, 0, 1, 1], [], []>} : vector<8x32xf32>, vector<32x256xf32>, vector<8x256xf32> -> vector<8x256xf32>
    %c0_18 = arith.constant 0 : index
    %c0_19 = arith.constant 0 : index
    %39 = vector.load %arg5[%c0_18, %c0_19] : memref<8x1xf32, #tpu.memory_space<vmem>>, vector<8x1xf32>
    %40 = vector.broadcast %39 : vector<8x1xf32> to vector<8x256xf32>
    %41 = arith.addf %38, %40 : vector<8x256xf32>
    %cst_20 = arith.constant 0.000000e+00 : f32
    %42 = vector.broadcast %cst_20 : f32 to vector<8x256xf32>
    %43 = arith.maximumf %41, %42 : vector<8x256xf32>
    %c0_21 = arith.constant 0 : index
    %c0_22 = arith.constant 0 : index
    %44 = vector.load %arg7[%c0_21, %c0_22] : memref<8x8xf32, #tpu.memory_space<vmem>>, vector<8x8xf32>
    %cst_23 = arith.constant dense<0.000000e+00> : vector<8x256xf32>
    %45 = tpu.matmul %44, %43, %cst_23 {dimension_numbers = #tpu.dot_dimension_numbers<[1], [0], [0], [1], [0, 0, 1, 1], [], []>} : vector<8x8xf32>, vector<8x256xf32>, vector<8x256xf32> -> vector<8x256xf32>
    %c0_24 = arith.constant 0 : index
    %c0_25 = arith.constant 0 : index
    %46 = vector.load %arg8[%c0_24, %c0_25] : memref<8x1xf32, #tpu.memory_space<vmem>>, vector<8x1xf32>
    %47 = vector.broadcast %46 : vector<8x1xf32> to vector<8x256xf32>
    %48 = arith.addf %45, %47 : vector<8x256xf32>
    %49 = arith.negf %48 : vector<8x256xf32>
    %50 = math.exp %49 : vector<8x256xf32>
    %cst_26 = arith.constant 1.000000e+00 : f32
    %51 = vector.broadcast %cst_26 : f32 to vector<8x256xf32>
    %52 = arith.addf %51, %50 : vector<8x256xf32>
    %53 = arith.divf %51, %52 : vector<8x256xf32>
    %c0_27 = arith.constant 0 : index
    %c0_28 = arith.constant 0 : index
    %54 = vector.load %arg9[%c0_27, %c0_28] : memref<8x256xf32, #tpu.memory_space<vmem>>, vector<8x256xf32>
    tpu.vector_store %arg9[%c0_27, %c0_28], %53 {strides = array<i32>} : memref<8x256xf32, #tpu.memory_space<vmem>>, vector<8x256xf32>,
    return
  }
  func.func @transform_0(%arg0: i32) -> (i32, i32, i32) {
    %c0_i32 = arith.constant 0 : i32
    %c0_i32_0 = arith.constant 0 : i32
    %c0_i32_1 = arith.constant 0 : i32
    return %arg0, %c0_i32, %c0_i32_0 : i32, i32, i32
  }
  func.func @transform_1(%arg0: i32) -> i32 {
    %c0_i32 = arith.constant 0 : i32
    %c0_i32_0 = arith.constant 0 : i32
    return %c0_i32 : i32
  }
  func.func @transform_2(%arg0: i32) -> (i32, i32) {
    %c0_i32 = arith.constant 0 : i32
    %c0_i32_0 = arith.constant 0 : i32
    %c0_i32_1 = arith.constant 0 : i32
    return %c0_i32, %c0_i32_0 : i32, i32
  }
  func.func @transform_3(%arg0: i32) -> (i32, i32) {
    %c0_i32 = arith.constant 0 : i32
    %c0_i32_0 = arith.constant 0 : i32
    %c0_i32_1 = arith.constant 0 : i32
    return %c0_i32, %c0_i32_0 : i32, i32
  }
  func.func @transform_4(%arg0: i32) -> (i32, i32) {
    %c0_i32 = arith.constant 0 : i32
    %c0_i32_0 = arith.constant 0 : i32
    %c0_i32_1 = arith.constant 0 : i32
    return %c0_i32, %c0_i32_0 : i32, i32
  }
  func.func @transform_5(%arg0: i32) -> (i32, i32) {
    %c0_i32 = arith.constant 0 : i32
    %c0_i32_0 = arith.constant 0 : i32
    %c0_i32_1 = arith.constant 0 : i32
    return %c0_i32, %c0_i32_0 : i32, i32
  }
  func.func @transform_6(%arg0: i32) -> (i32, i32) {
    %c0_i32 = arith.constant 0 : i32
    %c0_i32_0 = arith.constant 0 : i32
    %c0_i32_1 = arith.constant 0 : i32
    return %c0_i32, %c0_i32_0 : i32, i32
  }
  func.func @transform_7(%arg0: i32) -> (i32, i32) {
    %c0_i32 = arith.constant 0 : i32
    %c0_i32_0 = arith.constant 0 : i32
    %c0_i32_1 = arith.constant 0 : i32
    return %c0_i32, %c0_i32_0 : i32, i32
  }
  func.func @transform_8(%arg0: i32) -> (i32, i32) {
    %c0_i32 = arith.constant 0 : i32
    %c0_i32_0 = arith.constant 0 : i32
    return %arg0, %c0_i32 : i32, i32
  }
}

</mosaic_0001>

<bundles_post_ra>
// kernel: newsp_block_pallas.1
= control target key start
LH: loop header
LB: loop body
LE: loop exit
PB: predicated region body
PF: predicated region fallthrough
CT: control target
= control target key end

     0   :  { %13 = vsyncpa [#allocation3], 0  ;;  %s1705_s0 = inlined_call_operand.vmem [shape: f32[8,16,16], index: 0, kind: input, shape index: {}]   ;;  %s1706_s1 = inlined_call_operand.vmem [shape: f32[2], index: 1, kind: input, shape index: {}]   ;;  %s1707_s2 = inlined_call_operand.vmem [shape: f32[8,24], index: 2, kind: input, shape index: {}]   ;;  %s1708_s3 = inlined_call_operand.vmem [shape: f32[8,24], index: 3, kind: input, shape index: {}]   ;;  %s1709_s4 = inlined_call_operand.vmem [shape: f32[8,1], index: 4, kind: input, shape index: {}]   ;;  %s1710_s5 = inlined_call_operand.vmem [shape: f32[32,256], index: 5, kind: input, shape index: {}]   ;;  %s1711_s6 = inlined_call_operand.vmem [shape: f32[8,8], index: 6, kind: input, shape index: {}]   ;;  %s1712_s7 = inlined_call_operand.vmem [shape: f32[8,1], index: 7, kind: input, shape index: {}]   ;;  %s1713_s8 = inlined_call_operand.vmem [shape: f32[8,256], index: 8, kind: output, shape index: {}]  }
   0x1   :  { %s22_s29 = sshll.u32 %s1706_s1, 4  ;;  %s23_s29 = int_to_ptr.vmem [resolvable:$true] %s22_s29 }
   0x2   :  { %s1078_s30 = scalar_lea.vmem %s23_s29, 16  ;;  %p1083_p1 = scmp.lt.s32.totalorder %s23_s29, %s23_s29 }
   0x3   :  { %p1079_p0 = scmp.ne.s32.totalorder %s23_s29, %s1078_s30  ;;  %p1084_p2 = scmp.lt.s32.totalorder %s1078_s30, %s1078_s30 }
   0x5   :  { %p1085_p3 = por %p1084_p2, %p1083_p1 }
   0x7   :  { %p1086_p4 = pnand %p1085_p3, %p1079_p0 }
   0x9   :  { %1089 = shalt.err (!%p1086_p4)
}
   0xa   :  { %s1092_s9 = smov [#allocation2]  }
   0xb   :  { %25 = dma.vmem_to_smem %s23_s29, 16, %s1092_s9, [#allocation3]  }
   0xc   :  { %1090 = dma.done.wait [#allocation3], 16  }
   0xd   :  { %1091 = vsyncadd [#allocation3], 4294967280 }
   0xe   :  { %41 = sfence }
   0xf   :  { %v44_v0 = vld [vmem:[%s1705_s0] sm:$0xff]  ;;  %vm60_vm0 = vcmask 130048   ;;  %v45_v1 = vld [vmem:[%s1705_s0 + $0x8] sm:$0xff]  ;;  %s1153_s13 = sld [smem:[#allocation2]]  ;;  %v46_v2 = vld [vmem:[%s1705_s0 + $0x10] sm:$0xff]  ;;  %vm461_vm1 = vcmask 1041409  }
  0x10   :  { %v61_v3 = vsel %vm60_vm0, %v44_v0, 0.0  ;;  %v1160_v4 = vsel %vm60_vm0, %v44_v0, -inf  ;;  %v64_v5 = vsel %vm60_vm0, %v45_v1, 0.0  ;;  %v1164_v6 = vsel %vm60_vm0, %v45_v1, -inf  ;;  %v47_v9 = vld [vmem:[%s1705_s0 + $0x18] sm:$0xff]  ;;  %v48_v12 = vld [vmem:[%s1705_s0 + $0x20] sm:$0xff] }
  0x11   :  { %62 = vadd.xlane.f32.xlu1 %v61_v3  ;;  %v296_v7 = vmax.f32 %v1160_v4, %v1164_v6  ;;  %v224_v8 = vadd.f32 %v64_v5, %v61_v3  ;;  %v1172_v10 = vsel %vm60_vm0, %v46_v2, 0.0  ;;  %v1175_v11 = vsel %vm60_vm0, %v46_v2, -inf  ;;  %v49_v13 = vld [vmem:[%s1705_s0 + $0x28] sm:$0xff]  ;;  %v50_v18 = vld [vmem:[%s1705_s0 + $0x30] sm:$0xff]  ;;  %v51_v26 = vld [vmem:[%s1705_s0 + $0x38] sm:$0xff]  ;;  %s1207_s26 = sld [smem:[#allocation2 + $0x1]] }
  0x12   :  { %v70_v14 = vsel %vm60_vm0, %v47_v9, 0.0  ;;  %v1185_v15 = vsel %vm60_vm0, %v47_v9, -inf  ;;  %v73_v16 = vsel %vm60_vm0, %v48_v12, 0.0  ;;  %v1189_v17 = vsel %vm60_vm0, %v48_v12, -inf  ;;  %s1096_s20 = smov 1   ;;  %s1098_s18 = smov 16  }
  0x13   :  { %v297_v19 = vrot.slane %v296_v7, 4  ;;  %v225_v20 = vrot.slane %v224_v8, 4  ;;  %v231_v21 = vadd.f32 %v70_v14, %v1172_v10  ;;  %v303_v22 = vmax.f32 %v1175_v11, %v1185_v15 }
  0x14   :  { %v76_v23 = vsel %vm60_vm0, %v49_v13, 0.0  ;;  %v1199_v24 = vsel %vm60_vm0, %v49_v13, -inf  ;;  %v1202_v25 = vsel %vm60_vm0, %v50_v18, 0.0  ;;  %v1210_v30 = vsel %vm60_vm0, %v50_v18, -inf  ;;  %v52_v18 = vld [vmem:[%s1705_s0 + $0x40] sm:$0xff] }
  0x15   :  { %v298_v27 = vmax.f32 %v296_v7, %v297_v19  ;;  %65 = vadd.xlane.f32.xlu1 %v64_v5  ;;  %v226_v28 = vadd.f32 %v225_v20, %v224_v8  ;;  %v232_v29 = vrot.slane %v231_v21, 4  ;;  %v1213_v31 = vstv %s1153_s13 }
  0x16   :  { %v304_v32 = vrot.slane %v303_v22, 4  ;;  %v238_v33 = vadd.f32 %v76_v23, %v73_v16  ;;  %v310_v34 = vmax.f32 %v1189_v17, %v1199_v24  ;;  %v1218_v38 = vsel %vm60_vm0, %v51_v26, 0.0 }
  0x17   :  { %v299_v35 = vrot.slane %v298_v27, 2  ;;  %v227_v36 = vrot.slane %v226_v28, 2  ;;  %v233_v37 = vadd.f32 %v232_v29, %v231_v21  ;;  %v1221_v42 = vsel %vm60_vm0, %v51_v26, -inf  ;;  %v53_v26 = vld [vmem:[%s1705_s0 + $0x48] sm:$0xff] }
  0x18   :  { %v305_v39 = vmax.f32 %v303_v22, %v304_v32  ;;  %v239_v40 = vrot.slane %v238_v33, 4  ;;  %v311_v41 = vrot.slane %v310_v34, 4  ;;  %v245_v46 = vadd.f32 %v1218_v38, %v1202_v25 }
  0x19   :  { %v300_v43 = vmax.f32 %v298_v27, %v299_v35  ;;  %v228_v44 = vadd.f32 %v227_v36, %v226_v28  ;;  %v234_v45 = vrot.slane %v233_v37, 2  ;;  %71 = vadd.xlane.f32.xlu1 %v70_v14  ;;  %v317_v50 = vmax.f32 %v1210_v30, %v1221_v42  ;;  %v54_v27 = vld [vmem:[%s1705_s0 + $0x50] sm:$0xff] }
  0x1a   :  { %v306_v47 = vrot.slane %v305_v39, 2  ;;  %v240_v48 = vadd.f32 %v239_v40, %v238_v33  ;;  %v312_v49 = vmax.f32 %v310_v34, %v311_v41  ;;  %v246_v54 = vrot.slane %v245_v46, 4  ;;  %v56_v33 = vld [vmem:[%s1705_s0 + $0x60] sm:$0xff]  ;;  %v57_v40 = vld [vmem:[%s1705_s0 + $0x68] sm:$0xff]  ;;  %v58_v41 = vld [vmem:[%s1705_s0 + $0x70] sm:$0xff] }
  0x1b   :  { %v301_v51 = vrot.slane %v300_v43, 1  ;;  %v229_v52 = vrot.slane %v228_v44, 1  ;;  %v235_v53 = vadd.f32 %v234_v45, %v233_v37  ;;  %v318_v58 = vrot.slane %v317_v50, 4 }
  0x1c   :  { %v307_v55 = vmax.f32 %v305_v39, %v306_v47  ;;  %v241_v56 = vrot.slane %v240_v48, 2  ;;  %v313_v57 = vrot.slane %v312_v49, 2  ;;  %v1228_v59 = vstv %s1207_s26 }
  0x1d   :  { %v230_v60 = vadd.f32 %v229_v52, %v228_v44  ;;  %v236_v61 = vrot.slane %v235_v53, 1  ;;  %74 = vadd.xlane.f32.xlu1 %v73_v16  ;;  %v247_v62 = vadd.f32 %v246_v54, %v245_v46  ;;  %v319_v2 = vmax.f32 %v317_v50, %v318_v58 }
  0x1e   :  { %v308_v63 = vrot.slane %v307_v55, 1  ;;  %v242_v0 = vadd.f32 %v241_v56, %v240_v48  ;;  %v314_v1 = vmax.f32 %v312_v49, %v313_v57  ;;  %v302_v3 = vmax.f32 %v300_v43, %v301_v51  ;;  %v59_v43 = vld [vmem:[%s1705_s0 + $0x78] sm:$0xff] }
  0x1f   :  { %v280_v5 = vmul.f32 0.0625, %v230_v60  ;;  %v237_v7 = vadd.f32 %v236_v61, %v235_v53  ;;  %v248_v8 = vrot.slane %v247_v62, 2  ;;  %v320_v14 = vrot.slane %v319_v2, 2 }
  0x20   :  { %v309_v9 = vmax.f32 %v307_v55, %v308_v63  ;;  %v243_v12 = vrot.slane %v242_v0, 1  ;;  %v315_v13 = vrot.slane %v314_v1, 1  ;;  %v1243_v29 = vmul.f32 %v302_v3, %v1228_v59 }
  0x21   :  { %v281_v19 = vmul.f32 0.0625, %v237_v7  ;;  %77 = vadd.xlane.f32.xlu1 %v76_v23  ;;  %v249_v16 = vadd.f32 %v248_v8, %v247_v62  ;;  %v321_v22 = vmax.f32 %v319_v2, %v320_v14  ;;  %v1240_v28 = vmul.f32 %v280_v5, %v1213_v31  ;;  %v55_v23 = vld [vmem:[%s1705_s0 + $0x58] sm:$0xff]  ;;  %s1095_s0 = smov 127  }
  0x22   :  { %v244_v20 = vadd.f32 %v243_v12, %v242_v0  ;;  %v316_v21 = vmax.f32 %v314_v1, %v315_v13  ;;  %v1252_v34 = vsel %vm60_vm0, %v52_v18, 0.0  ;;  %v1258_v36 = vmul.f32 %v309_v9, %v1228_v59 }
  0x23   :  { %v250_v32 = vrot.slane %v249_v16, 1  ;;  %v1255_v35 = vmul.f32 %v281_v19, %v1213_v31  ;;  %v322_v39 = vrot.slane %v321_v22, 1  ;;  %v1274_v46 = vsel %vm60_vm0, %v53_v26, 0.0 }
  0x24   :  { %v282_v37 = vmul.f32 0.0625, %v244_v20  ;;  %v1270_v44 = vmul.f32 %v316_v21, %v1228_v59  ;;  %v1277_v47 = vsel %vm60_vm0, %v54_v27, 0.0  ;;  %v1283_v50 = vsel %vm60_vm0, %v55_v23, 0.0 }
  0x25   :  { %80 = vadd.xlane.f32.xlu1 %v1202_v25  ;;  %v251_v45 = vadd.f32 %v250_v32, %v249_v16  ;;  %v323_v49 = vmax.f32 %v321_v22, %v322_v39  ;;  %v1286_v51 = vsel %vm60_vm0, %v56_v33, 0.0  ;;  %v1289_v25 = vsel %vm60_vm0, %v57_v40, 0.0 }
  0x26   :  { %v1280_v48 = vmul.f32 %v282_v37, %v1213_v31  ;;  %v1292_v53 = vsel %vm60_vm0, %v58_v41, 0.0  ;;  %v1295_v54 = vsel %vm60_vm0, %v59_v43, 0.0  ;;  %v1298_v55 = vsel %vm60_vm0, %v52_v18, -inf }
  0x27   :  { %v283_v52 = vmul.f32 0.0625, %v251_v45  ;;  %v1301_v56 = vsel %vm60_vm0, %v53_v26, -inf  ;;  %v1304_v57 = vsel %vm60_vm0, %v54_v27, -inf  ;;  %v1307_v58 = vsel %vm60_vm0, %v55_v23, -inf }
  0x28   :  { %v1311_v60 = vmul.f32 %v323_v49, %v1228_v59  ;;  %v1314_v61 = vsel %vm60_vm0, %v56_v33, -inf  ;;  %v1317_v62 = vsel %vm60_vm0, %v57_v40, -inf  ;;  %v1320_v63 = vsel %vm60_vm0, %v58_v41, -inf }
  0x29   :  { %83 = vadd.xlane.f32.xlu1 %v1218_v38  ;;  %1716 = vst [vmem:[#allocation5_spill] sm:$0xff] %v1317_v62  ;;  %v1323_v0 = vsel %vm60_vm0, %v59_v43, -inf  ;;  %v252_v1 = vadd.f32 %v1274_v46, %v1252_v34  ;;  %v259_v38 = vadd.f32 %v1283_v50, %v1277_v47  ;;  %v266_v2 = vadd.f32 %v1289_v25, %v1286_v51 }
  0x2a   :  { %1717 = vst [vmem:[#allocation6_spill] sm:$0xff] %v1323_v0  ;;  %v1332_v3 = vmul.f32 %v283_v52, %v1213_v31  ;;  %v273_v5 = vadd.f32 %v1295_v54, %v1292_v53  ;;  %v324_v7 = vmax.f32 %v1298_v55, %v1301_v56  ;;  %v331_v8 = vmax.f32 %v1304_v57, %v1307_v58 }
  0x2b   :  { %v253_v9 = vrot.slane %v252_v1, 4  ;;  %v260_v12 = vrot.slane %v259_v38, 4  ;;  %v267_v13 = vrot.slane %v266_v2, 4  ;;  %v338_v14 = vmax.f32 %v1314_v61, %v1317_v62 }
  0x2c   :  { %v274_v18 = vrot.slane %v273_v5, 4  ;;  %v325_v19 = vrot.slane %v324_v7, 4  ;;  %v332_v16 = vrot.slane %v331_v8, 4  ;;  %v345_v20 = vmax.f32 %v1320_v63, %v1323_v0 }
  0x2d   :  { %144 = vmax.xlane.f32.xlu1 %v1160_v4  ;;  %v254_v21 = vadd.f32 %v253_v9, %v252_v1  ;;  %v261_v22 = vadd.f32 %v260_v12, %v259_v38  ;;  %v268_v26 = vadd.f32 %v267_v13, %v266_v2  ;;  %v339_v27 = vrot.slane %v338_v14, 4 }
  0x2e   :  { %v275_v32 = vadd.f32 %v274_v18, %v273_v5  ;;  %v326_v23 = vmax.f32 %v324_v7, %v325_v19  ;;  %v333_v33 = vmax.f32 %v331_v8, %v332_v16  ;;  %v346_v37 = vrot.slane %v345_v20, 4 }
  0x2f   :  { %v255_v39 = vrot.slane %v254_v21, 2  ;;  %v262_v40 = vrot.slane %v261_v22, 2  ;;  %v269_v41 = vrot.slane %v268_v26, 2  ;;  %v340_v43 = vmax.f32 %v338_v14, %v339_v27 }
  0x30   :  { %v276_v45 = vrot.slane %v275_v32, 2  ;;  %v327_v49 = vrot.slane %v326_v23, 2  ;;  %v334_v52 = vrot.slane %v333_v33, 2  ;;  %v347_v62 = vmax.f32 %v345_v20, %v346_v37 }
  0x31   :  { %147 = vmax.xlane.f32.xlu1 %v1164_v6  ;;  %v256_v0 = vadd.f32 %v255_v39, %v254_v21  ;;  %v263_v4 = vadd.f32 %v262_v40, %v261_v22  ;;  %v270_v1 = vadd.f32 %v269_v41, %v268_v26  ;;  %v341_v38 = vrot.slane %v340_v43, 2 }
  0x32   :  { %v277_v2 = vadd.f32 %v276_v45, %v275_v32  ;;  %v328_v9 = vmax.f32 %v326_v23, %v327_v49  ;;  %v335_v5 = vmax.f32 %v333_v33, %v334_v52  ;;  %v348_v7 = vrot.slane %v347_v62, 2 }
  0x33   :  { %v257_v8 = vrot.slane %v256_v0, 1  ;;  %v264_v12 = vrot.slane %v263_v4, 1  ;;  %v271_v13 = vrot.slane %v270_v1, 1  ;;  %v342_v18 = vmax.f32 %v340_v43, %v341_v38 }
  0x34   :  { %v278_v19 = vrot.slane %v277_v2, 1  ;;  %v329_v14 = vrot.slane %v328_v9, 1  ;;  %v336_v16 = vrot.slane %v335_v5, 1  ;;  %v349_v27 = vmax.f32 %v347_v62, %v348_v7 }
  0x35   :  { %150 = vmax.xlane.f32.xlu1 %v1175_v11  ;;  %v258_v20 = vadd.f32 %v257_v8, %v256_v0  ;;  %v265_v6 = vadd.f32 %v264_v12, %v263_v4  ;;  %v272_v21 = vadd.f32 %v271_v13, %v270_v1  ;;  %v343_v22 = vrot.slane %v342_v18, 1 }
  0x36   :  { %v279_v26 = vadd.f32 %v278_v19, %v277_v2  ;;  %v330_v37 = vmax.f32 %v328_v9, %v329_v14  ;;  %v337_v32 = vmax.f32 %v335_v5, %v336_v16  ;;  %v350_v23 = vrot.slane %v349_v27, 1 }
  0x37   :  { %v284_v33 = vmul.f32 0.0625, %v258_v20  ;;  %v285_v39 = vmul.f32 0.0625, %v265_v6  ;;  %v286_v40 = vmul.f32 0.0625, %v272_v21  ;;  %v344_v41 = vmax.f32 %v342_v18, %v343_v22  ;;  %v834_v6 = vld [vmem:[%s1710_s5 + $0x18] sm:$0xff] }
  0x38   :  { %v360_v43 = vadd.f32 %v1243_v29, %v1240_v28  ;;  %v287_v45 = vmul.f32 0.0625, %v279_v26  ;;  %v351_v49 = vmax.f32 %v349_v27, %v350_v23  ;;  %v356_v62 = vmul.f32 %v330_v37, %v1228_v59  ;;  %v752_v37 = vld [vmem:[%s1708_s3] sm:$0xff] }
  0x39   :  { %86 = vadd.xlane.f32.xlu1 %v1252_v34  ;;  %v361_v11 = vadd.f32 %v1258_v36, %v1255_v35  ;;  %v292_v0 = vmul.f32 %v284_v33, %v1213_v31  ;;  %v293_v52 = vmul.f32 %v285_v39, %v1213_v31  ;;  %v357_v4 = vmul.f32 %v337_v32, %v1228_v59 }
  0x3a   :  { %v362_v1 = vadd.f32 %v1270_v44, %v1280_v48  ;;  %v294_v28 = vmul.f32 %v286_v40, %v1213_v31  ;;  %v358_v29 = vmul.f32 %v344_v41, %v1228_v59  ;;  %v363_v34 = vadd.f32 %v1311_v60, %v1332_v3 }
  0x3b   :  { %v295_v38 = vmul.f32 %v287_v45, %v1213_v31  ;;  %v359_v35 = vmul.f32 %v351_v49, %v1228_v59  ;;  %vm463_vm2 = vcmask 1042434   ;;  %v364_v36 = vadd.f32 %v356_v62, %v292_v0 }
  0x3c   :  { %vm465_vm3 = vcmask 1043459   ;;  %v365_v2 = vadd.f32 %v357_v4, %v293_v52  ;;  %vm467_vm4 = vcmask 1044484   ;;  %v661_v44 = vsel %vm461_vm1, %v361_v11, %v360_v43 }
  0x3d   :  { %156 = vmax.xlane.f32.xlu1 %v1189_v17  ;;  %v366_v48 = vadd.f32 %v358_v29, %v294_v28  ;;  %vm469_vm5 = vcmask 1045509   ;;  %v662_v9 = vsel %vm463_vm2, %v362_v1, %v661_v44  ;;  %v1093_v5 = vmov 0.0  }
  0x3e   :  { %1052 = vmatprep.subr.mxu1 %v1093_v5  ;;  %1043 = vmatprep.subr.mxu0 %v1093_v5  ;;  %v367_v60 = vadd.f32 %v359_v35, %v295_v38  ;;  %vm471_vm6 = vcmask 1046534   ;;  %v663_v3 = vsel %vm465_vm3, %v363_v34, %v662_v9  ;;  %vm1094_vm7 = vmmov 0  }
  0x3f   :  { %1058 = vmatprep.mubr.msk.f32.mxu1 %vm1094_vm7, %v1093_v5  ;;  %1049 = vmatprep.mubr.msk.f32.mxu0 %vm1094_vm7, %v1093_v5  ;;  %vm473_vm8 = vcmask 1047559   ;;  %v664_v17 = vsel %vm467_vm4, %v364_v36, %v663_v3  ;;  %vm561_vm9 = vcmask 121856   ;;  %vm476_vm10 = vcmask 7168  }
  0x40   :  { %v665_v7 = vsel %vm469_vm5, %v365_v2, %v664_v17  ;;  %vm1413_vm11 = vmneg %vm476_vm10  ;;  %vm678_vm12 = vcmask 195584   ;;  %vm396_vm13 = vcmask 138312   ;;  %vm488_vm14 = vcmask 121912  }
  0x41   :  { %92 = vadd.xlane.f32.xlu1 %v1277_v47  ;;  %v666_v8 = vsel %vm471_vm6, %v366_v48, %v665_v7  ;;  %vm573_vm15 = vcmask 130112   ;;  %vm648_vm7 = vcmask 1046528  }
  0x42   :  { %v667_v12 = vsel %vm473_vm8, %v367_v60, %v666_v8 }
  0x43   :  { %672 = vrot.lane.b32.xlu0 %v667_v12, %s1095_s0 }
  0x45   :  { %162 = vmax.xlane.f32.xlu1 %v1210_v30  ;;  %v1718_v30 = vld [vmem:[#allocation5_spill] sm:$0xff] }
  0x47   :  { %668 = vrot.lane.b32.xlu0 %v667_v12, %s1096_s20 }
  0x49   :  { %98 = vadd.xlane.f32.xlu1 %v1286_v51 }
  0x4d   :  { %168 = vmax.xlane.f32.xlu1 %v1298_v55 }
  0x51   :  { %104 = vadd.xlane.f32.xlu1 %v1292_v53 }
  0x55   :  { %174 = vmax.xlane.f32.xlu1 %v1304_v57 }
  0x59   :  { %180 = vmax.xlane.f32.xlu1 %v1314_v61 }
  0x5d   :  { %186 = vmax.xlane.f32.xlu1 %v1320_v63 }
  0x66   :  { %68 = vadd.xlane.f32.xlu0 %v1172_v10  ;;  %v1719_v10 = vld [vmem:[#allocation6_spill] sm:$0xff] }
  0x6a   :  { %153 = vmax.xlane.f32.xlu0 %v1185_v15 }
  0x6e   :  { %89 = vadd.xlane.f32.xlu0 %v1274_v46 }
  0x72   :  { %159 = vmax.xlane.f32.xlu0 %v1199_v24 }
  0x76   :  { %95 = vadd.xlane.f32.xlu0 %v1283_v50 }
  0x7a   :  { %165 = vmax.xlane.f32.xlu0 %v1221_v42  ;;  %v384_v42 = vlaneseq }
  0x7c   :  { %v385_v53 = vand.u32 127, %v384_v42  ;;  %v388_v55 = vshrl.u32 %v384_v42, 7 }
  0x7e   :  { %101 = vadd.xlane.f32.xlu0 %v1289_v25  ;;  %v478_v61 = vadd.s32 1, %v385_v53  ;;  %v391_v19 = vadd.s32 4294967287, %v385_v53  ;;  %v483_v14 = vadd.s32 4294967289, %v385_v53  ;;  %v568_v16 = vadd.s32 4294967288, %v385_v53 }
  0x7f   :  { %v1409_v27 = vsub.s32 %v385_v53, %v388_v55 }
  0x80   :  { %v1419_v22 = vsub.s32 %v478_v61, %v388_v55  ;;  %v1425_v33 = vsub.s32 %v391_v19, %v388_v55  ;;  %v1427_v39 = vsub.s32 %v483_v14, %v388_v55  ;;  %v1429_v40 = vsub.s32 %v568_v16, %v388_v55 }
  0x82   :  { %171 = vmax.xlane.f32.xlu0 %v1301_v56 }
  0x86   :  { %107 = vadd.xlane.f32.xlu0 %v1295_v54 }
  0x8a   :  { %177 = vmax.xlane.f32.xlu0 %v1307_v58  ;;  %v386_v58 = vadd.s32 4294967295, %v385_v53 }
  0x8c   :  { %v1417_v21 = vsub.s32 %v386_v58, %v388_v55 }
  0x8e   :  { %183 = vmax.xlane.f32.xlu0 %v1718_v30 }
  0x92   :  { %189 = vmax.xlane.f32.xlu0 %v1719_v10 }
  0x9a   :  { %v63_v15 = vpop.xlane.xlu1 %62 }
  0x9b   :  { %v110_v25 = vmul.f32 0.0625, %v63_v15 }
  0x9d   :  { %v127_v56 = vmul.f32 %v1213_v31, %v110_v25 }
  0x9e   :  { %v66_v46 = vpop.xlane.xlu1 %65 }
  0x9f   :  { %v111_v57 = vmul.f32 0.0625, %v66_v46 }
  0xa1   :  { %v128_v20 = vmul.f32 %v1213_v31, %v111_v57 }
  0xa2   :  { %v1396_v47 = vpop.xlane.xlu1 %71 }
  0xa3   :  { %v113_v15 = vmul.f32 0.0625, %v1396_v47 }
  0xa5   :  { %v130_v47 = vmul.f32 %v1213_v31, %v113_v15 }
  0xa6   :  { %v1398_v24 = vpop.xlane.xlu1 %74 }
  0xa7   :  { %v114_v8 = vmul.f32 0.0625, %v1398_v24 }
  0xa9   :  { %v131_v46 = vmul.f32 %v1213_v31, %v114_v8 }
  0xaa   :  { %v1400_v50 = vpop.xlane.xlu1 %77 }
  0xab   :  { %v115_v53 = vmul.f32 0.0625, %v1400_v50 }
  0xad   :  { %v132_v50 = vmul.f32 %v1213_v31, %v115_v53 }
  0xae   :  { %v1402_v51 = vpop.xlane.xlu1 %80 }
  0xb2   :  { %v1404_v54 = vpop.xlane.xlu1 %83 }
  0xb3   :  { %v117_v24 = vmul.f32 0.0625, %v1404_v54 }
  0xb5   :  { %v673_v13 = vpop.permute.xlu0 %672 }
  0xb6   :  { %v145_v63 = vpop.xlane.xlu1 %144  ;;  %1053 = vmatpush3.msk.msra.mxu1 %vm561_vm9, %v673_v13 }
  0xb7   :  { %v192_v18 = vmul.f32 %v1228_v59, %v145_v63  ;;  %1054 = vmatprep.subr.mxu1 %v1093_v5 }
  0xb8   :  { %1055 = vmatpush3.msra.mxu1 %v667_v12  ;;  %v116_v12 = vmul.f32 0.0625, %v1402_v51 }
  0xb9   :  { %v208_v26 = vadd.f32 %v192_v18, %v127_v56  ;;  %1056 = vmatprep.subr.mxu1 %v1093_v5  ;;  %v669_v23 = vpop.permute.xlu0 %668 }
  0xba   :  { %v148_v32 = vpop.xlane.xlu1 %147  ;;  %1057 = vmatpush3.msk.msra.mxu1 %vm1413_vm11, %v669_v23  ;;  %v133_v55 = vmul.f32 %v1213_v31, %v116_v12 }
  0xbb   :  { %v193_v41 = vmul.f32 %v1228_v59, %v148_v32  ;;  %1059 = vmatmul.mubr.msk.f32.vlgmr.msra.gmra.mxu1 %vm678_vm12, %v752_v37  ;;  %v390_v43 = vrot.slane %v208_v26, %v1417_v21  ;;  %v482_v45 = vrot.slane %v208_v26, %v1419_v22  ;;  %v567_v49 = vrot.slane %v208_v26, %v1409_v27 }
  0xbc   :  { %997 = vmatprep.mubr.f32.mxu1 %v1093_v5 }
  0xbd   :  { %v209_v62 = vadd.f32 %v193_v41, %v128_v20  ;;  %v134_v20 = vmul.f32 %v1213_v31, %v117_v24 }
  0xbe   :  { %v151_v29 = vpop.xlane.xlu1 %150 }
  0xbf   :  { %v395_v11 = vrot.slane %v209_v62, %v1425_v33  ;;  %v487_v0 = vrot.slane %v209_v62, %v1427_v39  ;;  %v572_v52 = vrot.slane %v209_v62, %v1429_v40  ;;  %v194_v23 = vmul.f32 %v1228_v59, %v151_v29 }
  0xc1   :  { %v1443_v4 = vsel %vm396_vm13, %v395_v11, %v390_v43  ;;  %v1446_v1 = vsel %vm488_vm14, %v487_v0, %v482_v45  ;;  %v1449_v28 = vsel %vm573_vm15, %v572_v52, %v567_v49 }
  0xc2   :  { %v87_v34 = vpop.xlane.xlu1 %86 }
  0xc3   :  { %v118_v42 = vmul.f32 0.0625, %v87_v34 }
  0xc5   :  { %v135_v13 = vmul.f32 %v1213_v31, %v118_v42 }
  0xc6   :  { %v157_v38 = vpop.xlane.xlu1 %156 }
  0xc7   :  { %v196_v25 = vmul.f32 %v1228_v59, %v157_v38 }
  0xc9   :  { %v1462_v18 = vadd.f32 %v196_v25, %v131_v46 }
  0xca   :  { %v93_v35 = vpop.xlane.xlu1 %92 }
  0xcb   :  { %v120_v56 = vmul.f32 0.0625, %v93_v35  ;;  %v410_v62 = vrot.slane %v1462_v18, %v1417_v21  ;;  %v502_v11 = vrot.slane %v1462_v18, %v1419_v22  ;;  %v587_v29 = vrot.slane %v1462_v18, %v1409_v27 }
  0xcd   :  { %v137_v14 = vmul.f32 %v1213_v31, %v120_v56 }
  0xce   :  { %v163_v36 = vpop.xlane.xlu1 %162 }
  0xcf   :  { %v198_v57 = vmul.f32 %v1228_v59, %v163_v36 }
  0xd1   :  { %v1467_v16 = vadd.f32 %v198_v57, %v133_v55 }
  0xd2   :  { %v99_v44 = vpop.xlane.xlu1 %98 }
  0xd3   :  { %v122_v58 = vmul.f32 0.0625, %v99_v44  ;;  %v419_v38 = vrot.slane %v1467_v16, %v1417_v21 }
  0xd5   :  { %v139_v26 = vmul.f32 %v1213_v31, %v122_v58 }
  0xd6   :  { %v169_v60 = vpop.xlane.xlu1 %168 }
  0xd7   :  { %v200_v19 = vmul.f32 %v1228_v59, %v169_v60 }
  0xd9   :  { %v1481_v52 = vadd.f32 %v200_v19, %v135_v13 }
  0xda   :  { %v105_v17 = vpop.xlane.xlu1 %104 }
  0xdb   :  { %v124_v37 = vmul.f32 0.0625, %v105_v17  ;;  %v428_v15 = vrot.slane %v1481_v52, %v1417_v21  ;;  %v520_v42 = vrot.slane %v1481_v52, %v1419_v22  ;;  %v605_v25 = vrot.slane %v1481_v52, %v1409_v27 }
  0xdd   :  { %v141_v44 = vmul.f32 %v1213_v31, %v124_v37 }
  0xde   :  { %v175_v30 = vpop.xlane.xlu1 %174 }
  0xdf   :  { %v202_v54 = vmul.f32 %v1228_v59, %v175_v30  ;;  %v596_v30 = vrot.slane %v1467_v16, %v1409_v27 }
  0xe1   :  { %v1487_v35 = vadd.f32 %v202_v54, %v137_v14 }
  0xe2   :  { %v181_v63 = vpop.xlane.xlu1 %180 }
  0xe3   :  { %v204_v32 = vmul.f32 %v1228_v59, %v181_v63  ;;  %v437_v53 = vrot.slane %v1487_v35, %v1417_v21  ;;  %v529_v56 = vrot.slane %v1487_v35, %v1419_v22  ;;  %v614_v57 = vrot.slane %v1487_v35, %v1409_v27 }
  0xe6   :  { %v187_v34 = vpop.xlane.xlu1 %186 }
  0xe7   :  { %v206_v12 = vmul.f32 %v1228_v59, %v187_v34 }
  0xef   :  { %v69_v2 = vpop.xlane.xlu0 %68 }
  0xf0   :  { %v112_v51 = vmul.f32 0.0625, %v69_v2  ;;  %v511_v2 = vrot.slane %v1467_v16, %v1419_v22 }
  0xf2   :  { %v129_v41 = vmul.f32 %v1213_v31, %v112_v51 }
  0xf3   :  { %v154_v48 = vpop.xlane.xlu0 %153 }
  0xf4   :  { %v195_v43 = vmul.f32 %v1228_v59, %v154_v48  ;;  %v1493_v48 = vadd.f32 %v204_v32, %v139_v26  ;;  %v210_v60 = vadd.f32 %v194_v23, %v129_v41 }
  0xf6   :  { %v493_v58 = vrot.slane %v210_v60, %v1419_v22  ;;  %v538_v14 = vrot.slane %v1493_v48, %v1419_v22  ;;  %v623_v32 = vrot.slane %v1493_v48, %v1409_v27  ;;  %v578_v23 = vrot.slane %v210_v60, %v1409_v27 }
  0xf7   :  { %v90_v9 = vpop.xlane.xlu0 %89 }
  0xf8   :  { %v119_v0 = vmul.f32 0.0625, %v90_v9 }
  0xfb   :  { %v160_v3 = vpop.xlane.xlu0 %159 }
  0xfc   :  { %v197_v45 = vmul.f32 %v1228_v59, %v160_v3  ;;  %v211_v3 = vadd.f32 %v195_v43, %v130_v47  ;;  %v1524_v47 = vadd.f32 %v206_v12, %v141_v44 }
  0xfe   :  { %v1496_v17 = vadd.f32 %v197_v45, %v132_v50  ;;  %v497_v51 = vrot.slane %v211_v3, %v1427_v39  ;;  %v405_v26 = vrot.slane %v211_v3, %v1425_v33  ;;  %v582_v41 = vrot.slane %v211_v3, %v1429_v40 }
  0xff   :  { %v96_v7 = vpop.xlane.xlu0 %95  ;;  %v547_v34 = vrot.slane %v1524_v47, %v1419_v22 }
 0x100   :  { %v121_v46 = vmul.f32 0.0625, %v96_v7  ;;  %v446_v7 = vrot.slane %v1493_v48, %v1417_v21  ;;  %v506_v63 = vrot.slane %v1496_v17, %v1427_v39  ;;  %v498_v45 = vsel %vm488_vm14, %v497_v51, %v493_v58 }
 0x101   :  { %v553_v22 = vsel %vm463_vm2, %v498_v45, %v1446_v1 }
 0x102   :  { %v138_v19 = vmul.f32 %v1213_v31, %v121_v46  ;;  %v632_v46 = vrot.slane %v1524_v47, %v1409_v27 }
 0x103   :  { %v166_v10 = vpop.xlane.xlu0 %165 }
 0x104   :  { %v199_v36 = vmul.f32 %v1228_v59, %v166_v10  ;;  %v136_v10 = vmul.f32 %v1213_v31, %v119_v0  ;;  %v455_v0 = vrot.slane %v1524_v47, %v1417_v21 }
 0x106   :  { %v1510_v55 = vadd.f32 %v199_v36, %v134_v20  ;;  %v401_v20 = vrot.slane %v210_v60, %v1417_v21  ;;  %v838_v21 = vld [vmem:[%s1710_s5 + $0x38] sm:$0xff] }
 0x107   :  { %v102_v61 = vpop.xlane.xlu0 %101 }
 0x108   :  { %v123_v50 = vmul.f32 0.0625, %v102_v61  ;;  %v515_v37 = vrot.slane %v1510_v55, %v1427_v39  ;;  %v406_v12 = vsel %vm396_vm13, %v405_v26, %v401_v20 }
 0x10a   :  { %v140_v44 = vmul.f32 %v1213_v31, %v123_v50 }
 0x10b   :  { %v172_v49 = vpop.xlane.xlu0 %171 }
 0x10c   :  { %v201_v9 = vmul.f32 %v1228_v59, %v172_v49  ;;  %v507_v49 = vsel %vm488_vm14, %v506_v63, %v502_v11  ;;  %v591_v11 = vrot.slane %v1496_v17, %v1429_v40  ;;  %v414_v63 = vrot.slane %v1496_v17, %v1425_v33 }
 0x10d   :  { %v462_v17 = vsel %vm461_vm1, %v406_v12, %v1443_v4 }
 0x10e   :  { %v1518_v24 = vadd.f32 %v201_v9, %v136_v10  ;;  %v516_v10 = vsel %vm488_vm14, %v515_v37, %v511_v2  ;;  %v592_v26 = vsel %vm573_vm15, %v591_v11, %v587_v29  ;;  %v415_v29 = vsel %vm396_vm13, %v414_v63, %v410_v62  ;;  %v832_v63 = vld [vmem:[%s1710_s5 + $0x8] sm:$0xff] }
 0x10f   :  { %v108_v8 = vpop.xlane.xlu0 %107 }
 0x110   :  { %v524_v61 = vrot.slane %v1518_v24, %v1427_v39  ;;  %v125_v9 = vmul.f32 0.0625, %v108_v8  ;;  %v583_v8 = vsel %vm573_vm15, %v582_v41, %v578_v23  ;;  %v432_v45 = vrot.slane %v1518_v24, %v1425_v33 }
 0x111   :  { %v638_v4 = vsel %vm461_vm1, %v583_v8, %v1449_v28  ;;  %v836_v8 = vld [vmem:[%s1710_s5 + $0x28] sm:$0xff]  ;;  %vm845_vm1 = vcmask 261120  }
 0x112   :  { %v525_v58 = vsel %vm488_vm14, %v524_v61, %v520_v42 }
 0x113   :  { %v178_v13 = vpop.xlane.xlu0 %177 }
 0x114   :  { %v203_v54 = vmul.f32 %v1228_v59, %v178_v13  ;;  %v554_v13 = vsel %vm465_vm3, %v507_v49, %v553_v22  ;;  %v677_v22 = vld [vmem:[%s1707_s2] sm:$0xff] }
 0x115   :  { %v555_v42 = vsel %vm467_vm4, %v516_v10, %v554_v13  ;;  %v839_v13 = vld [vmem:[%s1709_s4] sm:$0xff] }
 0x116   :  { %v1540_v43 = vadd.f32 %v203_v54, %v138_v19  ;;  %v600_v19 = vrot.slane %v1510_v55, %v1429_v40  ;;  %v142_v54 = vmul.f32 %v1213_v31, %v125_v9  ;;  %v556_v37 = vsel %vm469_vm5, %v525_v58, %v555_v42  ;;  %v835_v58 = vld [vmem:[%s1710_s5 + $0x20] sm:$0xff] }
 0x117   :  { %v184_v36 = vpop.xlane.xlu0 %183  ;;  %v609_v31 = vrot.slane %v1518_v24, %v1429_v40 }
 0x118   :  { %v533_v60 = vrot.slane %v1540_v43, %v1427_v39  ;;  %v205_v3 = vmul.f32 %v1228_v59, %v184_v36  ;;  %v441_v18 = vrot.slane %v1540_v43, %v1425_v33 }
 0x11a   :  { %v221_v51 = vadd.f32 %v205_v3, %v140_v44  ;;  %v534_v50 = vsel %vm488_vm14, %v533_v60, %v529_v56  ;;  %v423_v56 = vrot.slane %v1510_v55, %v1425_v33  ;;  %v618_v55 = vrot.slane %v1540_v43, %v1429_v40 }
 0x11b   :  { %v190_v2 = vpop.xlane.xlu0 %189  ;;  %v557_v41 = vsel %vm471_vm6, %v534_v50, %v556_v37  ;;  %v639_v44 = vsel %vm463_vm2, %v592_v26, %v638_v4  ;;  %v442_v52 = vsel %vm396_vm13, %v441_v18, %v437_v53  ;;  %v922_v4 = vld [vmem:[%s1711_s6] sm:$0xff] }
 0x11c   :  { %v542_v1 = vrot.slane %v221_v51, %v1427_v39  ;;  %v207_v20 = vmul.f32 %v1228_v59, %v190_v2  ;;  %v627_v28 = vrot.slane %v221_v51, %v1429_v40  ;;  %v450_v24 = vrot.slane %v221_v51, %v1425_v33  ;;  %v833_v51 = vld [vmem:[%s1710_s5 + $0x10] sm:$0xff] }
 0x11d   :  { %v619_v16 = vsel %vm573_vm15, %v618_v55, %v614_v57 }
 0x11e   :  { %v223_v23 = vadd.f32 %v207_v20, %v142_v54  ;;  %v543_v59 = vsel %vm488_vm14, %v542_v1, %v538_v14  ;;  %v601_v14 = vsel %vm573_vm15, %v600_v19, %v596_v30  ;;  %v424_v30 = vsel %vm396_vm13, %v423_v56, %v419_v38 }
 0x11f   :  { %v558_v61 = vsel %vm473_vm8, %v543_v59, %v557_v41  ;;  %v640_v38 = vsel %vm465_vm3, %v601_v14, %v639_v44  ;;  %v451_v27 = vsel %vm396_vm13, %v450_v24, %v446_v7  ;;  %v1097_v19 = vmov 0  }
 0x120   :  { %v551_v49 = vrot.slane %v223_v23, %v1427_v39  ;;  %v636_v62 = vrot.slane %v223_v23, %v1429_v40  ;;  %v562_v36 = vsel %vm561_vm9, %v558_v61, 0.0  ;;  %v610_v39 = vsel %vm573_vm15, %v609_v31, %v605_v25  ;;  %1068 = vset.pattern.permute.xlu0 %v1097_v19  ;;  %1069 = vset.pattern.permute.xlu1 %v1097_v19 }
 0x121   :  { %v459_v40 = vrot.slane %v223_v23, %v1425_v33  ;;  %v649_v60 = vrot.slane %v562_v36, 1  ;;  %v628_v33 = vsel %vm573_vm15, %v627_v28, %v623_v32  ;;  %v464_v25 = vsel %vm463_vm2, %v415_v29, %v462_v17  ;;  %842 = vperm.xlu0 %1068, %v839_v13   ;;  %v923_v17 = vld [vmem:[%s1712_s7] sm:$0xff] }
 0x122   :  { %v552_v9 = vsel %vm488_vm14, %v551_v49, %v547_v34  ;;  %v433_v34 = vsel %vm396_vm13, %v432_v45, %v428_v15  ;;  %v637_v12 = vsel %vm573_vm15, %v636_v62, %v632_v46  ;;  %v641_v57 = vsel %vm467_vm4, %v610_v39, %v640_v38 }
 0x123   :  { %v563_v43 = vsel %vm561_vm9, %v552_v9, 0.0  ;;  %v642_v11 = vsel %vm469_vm5, %v619_v16, %v641_v57  ;;  %v466_v32 = vsel %vm465_vm3, %v424_v30, %v464_v25  ;;  %v460_v35 = vsel %vm396_vm13, %v459_v40, %v455_v0  ;;  %v837_v0 = vld [vmem:[%s1710_s5 + $0x30] sm:$0xff] }
 0x124   :  { %v650_v3 = vrot.slane %v563_v43, 1  ;;  %v643_v10 = vsel %vm471_vm6, %v628_v33, %v642_v11  ;;  %v468_v53 = vsel %vm467_vm4, %v433_v34, %v466_v32  ;;  %vm929_vm2 = vcmask 64512  }
 0x125   :  { %v644_v46 = vsel %vm473_vm8, %v637_v12, %v643_v10  ;;  %v470_v48 = vsel %vm469_vm5, %v442_v52, %v468_v53 }
 0x126   :  { %v651_v15 = vsel %vm648_vm7, %v649_v60, %v650_v3  ;;  %v472_v7 = vsel %vm471_vm6, %v451_v27, %v470_v48 }
 0x127   :  { %1044 = vmatpush3.msra.mxu0 %v651_v15  ;;  %v474_v47 = vsel %vm473_vm8, %v460_v35, %v472_v7 }
 0x128   :  { %1045 = vmatprep.subr.mxu0 %v1093_v5 }
 0x129   :  { %1046 = vmatpush3.msra.mxu0 %v644_v46 }
 0x12a   :  { %1047 = vmatprep.subr.mxu0 %v1093_v5 }
 0x12b   :  { %1048 = vmatpush3.msk.msra.mxu0 %vm1413_vm11, %v474_v47 }
 0x12c   :  { %1050 = vmatmul.mubr.msk.f32.vlgmr.msra.gmra.mxu0 %vm678_vm12, %v677_v22  ;;  %873 = vmatprep.subr.mxu0 %v838_v21 }
 0x12d   :  { %874 = vmatpush1.msra.mxu0 %v837_v0  ;;  %913 = vmatprep.mubr.f32.mxu0 %v1093_v5  ;;  %v831_v5 = vld [vmem:[%s1710_s5] sm:$0xff] }
 0x12e   :  { %875 = vmatprep.subr.mxu0 %v836_v8 }
 0x12f   :  { %876 = vmatpush1.msra.mxu0 %v835_v58 }
 0x130   :  { %877 = vmatprep.subr.mxu0 %v834_v6 }
 0x131   :  { %878 = vmatpush1.msra.mxu0 %v833_v51 }
 0x132   :  { %879 = vmatprep.subr.mxu0 %v832_v63 }
 0x133   :  { %880 = vmatpush1.msra.mxu0 %v831_v5 }
 0x17b   :  { %v822_v2 = vpop.f32.mrf.mxu1 }
 0x17c   :  { %827 = vrot.lane.b32.xlu1 %v822_v2, %s1098_s18 }
 0x17d   :  { %v1060_v50 = vpop.f32.mrf.mxu1 }
 0x180   :  { %926 = vperm.xlu1 %1069, %v923_v17  }
 0x19c   :  { %v843_v26 = vpop.permute.xlu0 %842 }
 0x1ec   :  { %v748_v54 = vpop.f32.mrf.mxu0 }
 0x1ee   :  { %v828_v1 = vpop.permute.xlu1 %827  ;;  %v1051_v20 = vpop.f32.mrf.mxu0 }
 0x1ef   :  { %v830_v42 = vsel %vm60_vm0, %v748_v54, %v828_v1 }
 0x1f0   :  { %1031 = vmatmul.mubr.msk.f32.vlgmr.msra.gmra.mxu0 %vm845_vm1, %v830_v42 }
 0x1fb   :  { %v927_v29 = vpop.permute.xlu1 %926 }
 0x2b0   :  { %v915_v56 = vpop.f32.mrf.mxu0 }
 0x2b1   :  { %v916_v37 = vadd.f32 %v915_v56, %v843_v26 }
 0x2b2   :  { %v917_v31 = vpop.f32.mrf.mxu0 }
 0x2b3   :  { %v918_v23 = vadd.f32 %v917_v31, %v843_v26  ;;  %v920_v41 = vmax.f32 %v916_v37, 0.0 }
 0x2b5   :  { %v921_v59 = vmax.f32 %v918_v23, 0.0 }
 0x2b7   :  { %963 = vmatprep.subr.mxu1 %v921_v59 }
 0x2b8   :  { %964 = vmatpush1.msra.mxu1 %v920_v41 }
 0x2b9   :  { %1032 = vmatmul.mubr.msk.f32.vlgmr.msra.gmra.mxu1 %vm929_vm2, %v922_v4 }
 0x379   :  { %v999_v55 = vpop.f32.mrf.mxu1 }
 0x37a   :  { %v1000_v61 = vadd.f32 %v999_v55, %v927_v29 }
 0x37b   :  { %v1001_v14 = vpop.f32.mrf.mxu1 }
 0x37c   :  { %v1033_v45 = vmul.f32 -1.442695, %v1000_v61  ;;  %v1002_v28 = vadd.f32 %v1001_v14, %v927_v29 }
 0x37e   :  { %1070 = vpow2.f32 %v1033_v45  ;;  %v1034_v49 = vmul.f32 -1.442695, %v1002_v28 }
 0x380   :  { %1072 = vpow2.f32 %v1034_v49 }
 0x38b   :  { %v1071_v18 = vpop.eup %1070 }
 0x38c   :  { %v1010_v62 = vadd.f32 1.0, %v1071_v18 }
 0x38d   :  { %v1073_v36 = vpop.eup %1072 }
 0x38e   :  { %1074 = vrcp.f32 %v1010_v62  ;;  %v1011_v44 = vadd.f32 1.0, %v1073_v36 }
 0x390   :  { %1076 = vrcp.f32 %v1011_v44 }
 0x39b   :  { %v1075_v30 = vpop.eup %1074 }
 0x39c   :  { %1016 = vst [vmem:[%s1713_s8] sm:$0xff] %v1075_v30 }
 0x39d   :  { %v1077_v24 = vpop.eup %1076 }
 0x39e   :  { %1017 = vst [vmem:[%s1713_s8 + $0x8] sm:$0xff] %v1077_v24 }
 0x39f   :  { %1022 = vsyncpa [#allocation3], 1 }

</bundles_post_ra>
